<compile_context>
chip_gen: v6e
topology: v6e:2x2x1
jax: 0.10.0
libtpu: 0.0.40
codegen_flags: <defaults>
</compile_context>

<pallas_src>
import jax
import jax.numpy as jnp
from jax.experimental import pallas as pl
from jax.experimental.pallas import tpu as pltpu


def _parametric_log_kernel(x_ref, c1_ref, c2_ref, o_ref):
    # Compute in f32 regardless of input dtype (v5e has no bf16 VPU/EUP path).
    x = x_ref[...].astype(jnp.float32)
    c1 = c1_ref[...].astype(jnp.float32)
    c2 = c2_ref[...].astype(jnp.float32)
    pos_v = jnp.maximum(x, 0.0)          # relu(x)
    neg_v = jnp.maximum(-x, 0.0)         # == -(x - |x|) * 0.5
    pos = jnp.log(pos_v + jnp.abs(c1) + 1.0)
    neg = -jnp.log(neg_v + jnp.abs(c2) + 1.0)
    o_ref[...] = (pos + neg).astype(o_ref.dtype)


_LANES = 1024       # lane-dense last dim (multiple of 128)
_TILE_ROWS = 512    # rows per grid step (multiple of 8)


def parametric_log(x, c1, c2):
    """x, c1, c2: arrays of identical shape (e.g. NCHW). Returns same shape/dtype."""
    orig_shape = x.shape
    dtype = x.dtype
    total = x.size

    # Flatten everything and pad so it reshapes into full (tile_rows, lanes) tiles.
    lanes = _LANES
    rows = pl.cdiv(total, lanes)
    tile_rows = _TILE_ROWS if rows >= _TILE_ROWS else ((rows + 7) // 8) * 8
    padded_rows = pl.cdiv(rows, tile_rows) * tile_rows
    pad = padded_rows * lanes - total

    def _prep(a):
        a = a.reshape(-1)
        if pad:
            a = jnp.pad(a, (0, pad))  # zeros: log(0 + |0| + 1) = 0, no NaNs
        return a.reshape(padded_rows, lanes)

    x2, c12, c22 = _prep(x), _prep(c1), _prep(c2)

    spec = pl.BlockSpec((tile_rows, lanes), lambda i: (i, 0))
    grid = (padded_rows // tile_rows,)

    out2 = pl.pallas_call(
        _parametric_log_kernel,
        out_shape=jax.ShapeDtypeStruct((padded_rows, lanes), dtype),
        grid=grid,
        in_specs=[spec, spec, spec],
        out_specs=spec,
        compiler_params=pltpu.CompilerParams(
            # Grid steps are independent: shard across TensorCores on v7x
            # (no-op on single-TC v5e/v6e).
            dimension_semantics=("parallel",),
        ),
        cost_estimate=pl.CostEstimate(
            flops=8 * total,
            transcendentals=2 * total,
            bytes_accessed=16 * total,  # 3 f32 reads + 1 f32 write per element
        ),
    )(x2, c12, c22)

    return out2.reshape(-1)[:total].reshape(orig_shape)


def reference(x, c1, c2):
    pos_v = jnp.maximum(x, 0.0)
    neg_v = -(x - jnp.abs(x)) * 0.5
    pos = jnp.log(pos_v + jnp.abs(c1) + 1.0)
    neg = -jnp.log(neg_v + jnp.abs(c2) + 1.0)
    return pos + neg


if __name__ == "__main__":
    key = jax.random.PRNGKey(0)
    kx, k1, k2 = jax.random.split(key, 3)

    # Small NCHW input consistent with a CIFAR-style activation map.
    x = jax.random.normal(kx, (2, 4, 16, 16), dtype=jnp.float32)
    # Deterministic stand-ins for the module's lazily-created c1/c2 params.
    c1 = jax.random.normal(k1, x.shape, dtype=jnp.float32)
    c2 = jax.random.normal(k2, x.shape, dtype=jnp.float32)

    out = parametric_log(x, c1, c2)
    out = jax.block_until_ready(out)

    ref = reference(x, c1, c2)
    assert out.shape == x.shape and out.dtype == x.dtype
    assert jnp.allclose(out, ref, atol=1e-5, rtol=1e-5)
    print("KERNEL_OK")
</pallas_src>

<mosaic_0001>
module attributes {stable_mosaic.version = 11 : i64} {
  func.func @_parametric_log_kernel(%arg0: i32, %arg1: memref<8x1024xf32, #tpu.memory_space<vmem>>, %arg2: memref<8x1024xf32, #tpu.memory_space<vmem>>, %arg3: memref<8x1024xf32, #tpu.memory_space<vmem>>, %arg4: memref<8x1024xf32, #tpu.memory_space<vmem>>) attributes {dimension_semantics = [#tpu.dimension_semantics<parallel>], iteration_bounds = array<i64: 1>, scalar_prefetch = 0 : i64, scratch_operands = 0 : i64, tpu.core_type = #tpu.core_type<tc>, window_params = [{transform_indices = @transform_0, window_bounds = array<i64: 8, 1024>}, {transform_indices = @transform_1, window_bounds = array<i64: 8, 1024>}, {transform_indices = @transform_2, window_bounds = array<i64: 8, 1024>}, {transform_indices = @transform_3, window_bounds = array<i64: 8, 1024>}]} {
    %c0 = arith.constant 0 : index
    %c0_0 = arith.constant 0 : index
    %0 = vector.load %arg1[%c0, %c0_0] : memref<8x1024xf32, #tpu.memory_space<vmem>>, vector<8x1024xf32>
    %c0_1 = arith.constant 0 : index
    %c0_2 = arith.constant 0 : index
    %1 = vector.load %arg2[%c0_1, %c0_2] : memref<8x1024xf32, #tpu.memory_space<vmem>>, vector<8x1024xf32>
    %c0_3 = arith.constant 0 : index
    %c0_4 = arith.constant 0 : index
    %2 = vector.load %arg3[%c0_3, %c0_4] : memref<8x1024xf32, #tpu.memory_space<vmem>>, vector<8x1024xf32>
    %cst = arith.constant 0.000000e+00 : f32
    %3 = vector.broadcast %cst : f32 to vector<8x1024xf32>
    %4 = arith.maximumf %0, %3 : vector<8x1024xf32>
    %cst_5 = arith.constant 0.000000e+00 : f32
    %5 = vector.broadcast %cst_5 : f32 to vector<8x1024xf32>
    %6 = arith.subf %5, %0 : vector<8x1024xf32>
    %cst_6 = arith.constant 0.000000e+00 : f32
    %7 = vector.broadcast %cst_6 : f32 to vector<8x1024xf32>
    %8 = arith.maximumf %6, %7 : vector<8x1024xf32>
    %9 = math.absf %1 : vector<8x1024xf32>
    %10 = arith.addf %4, %9 : vector<8x1024xf32>
    %cst_7 = arith.constant 1.000000e+00 : f32
    %11 = vector.broadcast %cst_7 : f32 to vector<8x1024xf32>
    %12 = arith.addf %10, %11 : vector<8x1024xf32>
    %13 = math.log %12 : vector<8x1024xf32>
    %14 = math.absf %2 : vector<8x1024xf32>
    %15 = arith.addf %8, %14 : vector<8x1024xf32>
    %cst_8 = arith.constant 1.000000e+00 : f32
    %16 = vector.broadcast %cst_8 : f32 to vector<8x1024xf32>
    %17 = arith.addf %15, %16 : vector<8x1024xf32>
    %18 = math.log %17 : vector<8x1024xf32>
    %cst_9 = arith.constant 0.000000e+00 : f32
    %19 = vector.broadcast %cst_9 : f32 to vector<8x1024xf32>
    %20 = arith.subf %19, %18 : vector<8x1024xf32>
    %21 = arith.addf %13, %20 : vector<8x1024xf32>
    %c0_10 = arith.constant 0 : index
    %c0_11 = arith.constant 0 : index
    %22 = vector.load %arg4[%c0_10, %c0_11] : memref<8x1024xf32, #tpu.memory_space<vmem>>, vector<8x1024xf32>
    tpu.vector_store %arg4[%c0_10, %c0_11], %21 {strides = array<i32>} : memref<8x1024xf32, #tpu.memory_space<vmem>>, vector<8x1024xf32>,
    return
  }
  func.func @transform_0(%arg0: i32) -> (i32, i32) {
    %c0_i32 = arith.constant 0 : i32
    %c0_i32_0 = arith.constant 0 : i32
    return %arg0, %c0_i32 : i32, i32
  }
  func.func @transform_1(%arg0: i32) -> (i32, i32) {
    %c0_i32 = arith.constant 0 : i32
    %c0_i32_0 = arith.constant 0 : i32
    return %arg0, %c0_i32 : i32, i32
  }
  func.func @transform_2(%arg0: i32) -> (i32, i32) {
    %c0_i32 = arith.constant 0 : i32
    %c0_i32_0 = arith.constant 0 : i32
    return %arg0, %c0_i32 : i32, i32
  }
  func.func @transform_3(%arg0: i32) -> (i32, i32) {
    %c0_i32 = arith.constant 0 : i32
    %c0_i32_0 = arith.constant 0 : i32
    return %arg0, %c0_i32 : i32, i32
  }
}

</mosaic_0001>

<bundles_post_ra>
// kernel: tpu_custom_call.1
= control target key start
LH: loop header
LB: loop body
LE: loop exit
PB: predicated region body
PF: predicated region fallthrough
CT: control target
= control target key end

     0   :  { %8 = vsyncpa [#allocation3], 0  ;;  %s376_s0 = inlined_call_operand.hbm [shape: f32[8,1024], index: 0, kind: input, shape index: {}]   ;;  %s377_s1 = inlined_call_operand.hbm [shape: f32[8,1024], index: 1, kind: input, shape index: {}]   ;;  %s378_s2 = inlined_call_operand.hbm [shape: f32[8,1024], index: 2, kind: input, shape index: {}]   ;;  %s379_s3 = inlined_call_operand.hbm [shape: f32[8,1024], index: 3, kind: output, shape index: {}]  }
   0x1   :  { %9 = vsyncpa [#allocation6], 0 }
   0x2   :  { %10 = vsyncpa [#allocation4], 0  ;;  %s340_s12 = smov [#allocation5]   ;;  %s341_s14 = smov [#allocation2]  }
   0x3   :  { %s27_s13 = sshll.u32 %s340_s12, 4  ;;  %s17_s15 = sshll.u32 %s341_s14, 4  ;;  %s28_s13 = int_to_ptr.vmem [resolvable:$true] %s27_s13  ;;  %s18_s15 = int_to_ptr.vmem [resolvable:$true] %s17_s15 }
   0x4   :  { %s262_s16 = scalar_lea.vmem %s28_s13, 1024  ;;  %p267_p1 = scmp.lt.s32.totalorder %s28_s13, %s28_s13 }
   0x5   :  { %p263_p0 = scmp.ne.s32.totalorder %s28_s13, %s262_s16  ;;  %p268_p2 = scmp.lt.s32.totalorder %s262_s16, %s262_s16 }
   0x7   :  { %p269_p3 = por %p268_p2, %p267_p1 }
   0x9   :  { %p270_p4 = pnand %p269_p3, %p263_p0 }
   0xb   :  { %273 = shalt.err (!%p270_p4)
}
   0xc   :  { %30 = dma.hbm_to_vmem [thread:$0]  %s377_s1, 1024, %s28_s13, [#allocation6]  }
   0xd   :  { %s282_s19 = scalar_lea.vmem %s18_s15, 1024  ;;  %p287_p6 = scmp.lt.s32.totalorder %s18_s15, %s18_s15 }
   0xe   :  { %p283_p5 = scmp.ne.s32.totalorder %s18_s15, %s282_s19  ;;  %p288_p7 = scmp.lt.s32.totalorder %s282_s19, %s282_s19 }
  0x10   :  { %p289_p8 = por %p288_p7, %p287_p6 }
  0x12   :  { %p290_p9 = pnand %p289_p8, %p283_p5 }
  0x14   :  { %293 = shalt.err (!%p290_p9)
}
  0x15   :  { %20 = dma.hbm_to_vmem [thread:$0]  %s376_s0, 1024, %s18_s15, [#allocation3]  }
  0x16   :  { %s342_s22 = smov [#allocation7]  }
  0x17   :  { %s37_s23 = sshll.u32 %s342_s22, 4  ;;  %s38_s23 = int_to_ptr.vmem [resolvable:$true] %s37_s23 }
  0x18   :  { %s302_s24 = scalar_lea.vmem %s38_s23, 1024  ;;  %p307_p11 = scmp.lt.s32.totalorder %s38_s23, %s38_s23 }
  0x19   :  { %p303_p10 = scmp.ne.s32.totalorder %s38_s23, %s302_s24  ;;  %p308_p12 = scmp.lt.s32.totalorder %s302_s24, %s302_s24 }
  0x1b   :  { %p309_p13 = por %p308_p12, %p307_p11 }
  0x1d   :  { %p310_p0 = pnand %p309_p13, %p303_p10 }
  0x1f   :  { %313 = shalt.err (!%p310_p0)
}
  0x20   :  { %40 = dma.hbm_to_vmem [thread:$0]  %s378_s2, 1024, %s38_s23, [#allocation6]  }
  0x21   :  { %334 = dma.done.wait [#allocation3], 1024  }
  0x22   :  { %335 = vsyncadd [#allocation3], 4294966272 }
  0x23   :  { %336 = dma.done.wait [#allocation6], 2048  }
  0x24   :  { %337 = vsyncadd [#allocation6], 4294965248  ;;  %v50_v0 = vld [vmem:[#allocation2] sm:$0xff]  ;;  %v51_v7 = vld [vmem:[#allocation2 + $0x8] sm:$0xff]  ;;  %s343_s0 = smov [#allocation8]  }
  0x25   :  { %v58_v1 = vld [vmem:[#allocation5] sm:$0xff]  ;;  %v74_v3 = vmax.f32 %v50_v0, 0.0  ;;  %v82_v4 = vsub.f32 0.0, %v50_v0  ;;  %v59_v8 = vld [vmem:[#allocation5 + $0x8] sm:$0xff]  ;;  %v75_v12 = vmax.f32 %v51_v7, 0.0  ;;  %v83_v13 = vsub.f32 0.0, %v51_v7 }
  0x26   :  { %v66_v2 = vld [vmem:[#allocation7] sm:$0xff]  ;;  %v98_v5 = vand.u32 2147483647, %v58_v1  ;;  %v67_v9 = vld [vmem:[#allocation7 + $0x8] sm:$0xff]  ;;  %v52_v14 = vld [vmem:[#allocation2 + $0x10] sm:$0xff]  ;;  %s208_s2 = sshll.u32 %s343_s0, 4  ;;  %s209_s2 = int_to_ptr.vmem [resolvable:$true] %s208_s2 }
  0x27   :  { %v138_v6 = vand.u32 2147483647, %v66_v2  ;;  %v90_v10 = vmax.f32 %v82_v4, 0.0  ;;  %v60_v15 = vld [vmem:[#allocation5 + $0x10] sm:$0xff]  ;;  %v99_v17 = vand.u32 2147483647, %v59_v8  ;;  %p319_p2 = scmp.lt.s32.totalorder %s209_s2, %s209_s2 }
  0x28   :  { %v106_v11 = vadd.f32 %v98_v5, %v74_v3  ;;  %v68_v16 = vld [vmem:[#allocation7 + $0x10] sm:$0xff]  ;;  %v139_v18 = vand.u32 2147483647, %v67_v9  ;;  %v76_v19 = vmax.f32 %v52_v14, 0.0  ;;  %v84_v20 = vsub.f32 0.0, %v52_v14  ;;  %v53_v25 = vld [vmem:[#allocation2 + $0x18] sm:$0xff] }
  0x29   :  { %v146_v22 = vadd.f32 %v138_v6, %v90_v10  ;;  %v91_v23 = vmax.f32 %v83_v13, 0.0  ;;  %v100_v24 = vand.u32 2147483647, %v60_v15  ;;  %v61_v26 = vld [vmem:[#allocation5 + $0x18] sm:$0xff]  ;;  %v107_v27 = vadd.f32 %v99_v17, %v75_v12  ;;  %v54_v39 = vld [vmem:[#allocation2 + $0x20] sm:$0xff]  ;;  %v55_v51 = vld [vmem:[#allocation2 + $0x28] sm:$0xff] }
  0x2a   :  { %v114_v21 = vadd.f32 1.0, %v106_v11  ;;  %v92_v28 = vmax.f32 %v84_v20, 0.0  ;;  %v140_v29 = vand.u32 2147483647, %v68_v16  ;;  %v69_v30 = vld [vmem:[#allocation7 + $0x18] sm:$0xff]  ;;  %v77_v31 = vmax.f32 %v53_v25, 0.0 }
  0x2b   :  { %v154_v32 = vadd.f32 1.0, %v146_v22  ;;  %v147_v33 = vadd.f32 %v139_v18, %v91_v23  ;;  %v108_v34 = vadd.f32 %v100_v24, %v76_v19  ;;  %v115_v35 = vadd.f32 1.0, %v107_v27  ;;  %v62_v40 = vld [vmem:[#allocation5 + $0x20] sm:$0xff]  ;;  %v63_v52 = vld [vmem:[#allocation5 + $0x28] sm:$0xff]  ;;  %v56_v60 = vld [vmem:[#allocation2 + $0x30] sm:$0xff]  ;;  %s314_s26 = scalar_lea.vmem %s209_s2, 1024 }
  0x2c   :  { %222 = vlog2.f32 %v114_v21  ;;  %v148_v36 = vadd.f32 %v140_v29, %v92_v28  ;;  %v85_v37 = vsub.f32 0.0, %v53_v25  ;;  %v101_v38 = vand.u32 2147483647, %v61_v26  ;;  %v70_v44 = vld [vmem:[#allocation7 + $0x20] sm:$0xff]  ;;  %v71_v56 = vld [vmem:[#allocation7 + $0x28] sm:$0xff]  ;;  %v64_v0 = vld [vmem:[#allocation5 + $0x30] sm:$0xff]  ;;  %p315_p1 = scmp.ne.s32.totalorder %s209_s2, %s314_s26  ;;  %p320_p3 = scmp.lt.s32.totalorder %s314_s26, %s314_s26 }
  0x2d   :  { %224 = vlog2.f32 %v154_v32  ;;  %v155_v41 = vadd.f32 1.0, %v147_v33  ;;  %v116_v42 = vadd.f32 1.0, %v108_v34  ;;  %v141_v43 = vand.u32 2147483647, %v69_v30  ;;  %v72_v1 = vld [vmem:[#allocation7 + $0x30] sm:$0xff]  ;;  %v57_v9 = vld [vmem:[#allocation2 + $0x38] sm:$0xff] }
  0x2e   :  { %226 = vlog2.f32 %v115_v35  ;;  %v156_v45 = vadd.f32 1.0, %v148_v36  ;;  %v93_v46 = vmax.f32 %v85_v37, 0.0  ;;  %v109_v47 = vadd.f32 %v101_v38, %v77_v31  ;;  %v65_v10 = vld [vmem:[#allocation5 + $0x38] sm:$0xff]  ;;  %p321_p4 = por %p320_p3, %p319_p2 }
  0x2f   :  { %228 = vlog2.f32 %v155_v41  ;;  %v78_v48 = vmax.f32 %v54_v39, 0.0  ;;  %v86_v49 = vsub.f32 0.0, %v54_v39  ;;  %v102_v50 = vand.u32 2147483647, %v62_v40  ;;  %v73_v14 = vld [vmem:[#allocation7 + $0x38] sm:$0xff] }
  0x30   :  { %230 = vlog2.f32 %v116_v42  ;;  %v117_v53 = vadd.f32 1.0, %v109_v47  ;;  %v149_v54 = vadd.f32 %v141_v43, %v93_v46  ;;  %v142_v55 = vand.u32 2147483647, %v70_v44  ;;  %p322_p5 = pnand %p321_p4, %p315_p1 }
  0x31   :  { %232 = vlog2.f32 %v156_v45  ;;  %v94_v57 = vmax.f32 %v86_v49, 0.0  ;;  %v110_v58 = vadd.f32 %v102_v50, %v78_v48  ;;  %v79_v59 = vmax.f32 %v55_v51, 0.0 }
  0x32   :  { %234 = vlog2.f32 %v117_v53  ;;  %v157_v61 = vadd.f32 1.0, %v149_v54  ;;  %v87_v62 = vsub.f32 0.0, %v55_v51  ;;  %v103_v63 = vand.u32 2147483647, %v63_v52 }
  0x33   :  { %v118_v2 = vadd.f32 1.0, %v110_v58  ;;  %v150_v3 = vadd.f32 %v142_v55, %v94_v57  ;;  %v143_v4 = vand.u32 2147483647, %v71_v56  ;;  %v80_v5 = vmax.f32 %v56_v60, 0.0 }
  0x34   :  { %236 = vlog2.f32 %v157_v61  ;;  %v95_v6 = vmax.f32 %v87_v62, 0.0  ;;  %v111_v7 = vadd.f32 %v103_v63, %v79_v59  ;;  %v88_v8 = vsub.f32 0.0, %v56_v60 }
  0x35   :  { %238 = vlog2.f32 %v118_v2  ;;  %v158_v11 = vadd.f32 1.0, %v150_v3  ;;  %v104_v12 = vand.u32 2147483647, %v64_v0  ;;  %v144_v13 = vand.u32 2147483647, %v72_v1 }
  0x36   :  { %v119_v15 = vadd.f32 1.0, %v111_v7  ;;  %v151_v16 = vadd.f32 %v143_v4, %v95_v6  ;;  %v96_v17 = vmax.f32 %v88_v8, 0.0  ;;  %v81_v18 = vmax.f32 %v57_v9, 0.0 }
  0x37   :  { %240 = vlog2.f32 %v158_v11  ;;  %v112_v19 = vadd.f32 %v104_v12, %v80_v5  ;;  %v89_v20 = vsub.f32 0.0, %v57_v9  ;;  %v105_v21 = vand.u32 2147483647, %v65_v10 }
  0x38   :  { %242 = vlog2.f32 %v119_v15  ;;  %v159_v23 = vadd.f32 1.0, %v151_v16  ;;  %v152_v24 = vadd.f32 %v144_v13, %v96_v17  ;;  %v145_v25 = vand.u32 2147483647, %v73_v14 }
  0x39   :  { %v223_v22 = vpop.eup %222  ;;  %v120_v26 = vadd.f32 1.0, %v112_v19  ;;  %v97_v27 = vmax.f32 %v89_v20, 0.0  ;;  %v113_v28 = vadd.f32 %v105_v21, %v81_v18 }
  0x3a   :  { %v225_v29 = vpop.eup %224  ;;  %v123_v30 = vmul.f32 0.6931472, %v223_v22  ;;  %244 = vlog2.f32 %v159_v23  ;;  %v160_v31 = vadd.f32 1.0, %v152_v24 }
  0x3b   :  { %v227_v32 = vpop.eup %226  ;;  %v163_v33 = vmul.f32 0.6931472, %v225_v29  ;;  %246 = vlog2.f32 %v120_v26  ;;  %v121_v34 = vadd.f32 1.0, %v113_v28  ;;  %v153_v35 = vadd.f32 %v145_v25, %v97_v27 }
  0x3c   :  { %v229_v36 = vpop.eup %228  ;;  %v125_v37 = vmul.f32 0.6931472, %v227_v32  ;;  %248 = vlog2.f32 %v160_v31 }
  0x3d   :  { %v231_v38 = vpop.eup %230  ;;  %v178_v39 = vsub.f32 0.0, %v163_v33  ;;  %v165_v40 = vmul.f32 0.6931472, %v229_v36  ;;  %250 = vlog2.f32 %v121_v34  ;;  %v161_v41 = vadd.f32 1.0, %v153_v35 }
  0x3e   :  { %v233_v42 = vpop.eup %232  ;;  %v127_v43 = vmul.f32 0.6931472, %v231_v38 }
  0x3f   :  { %v235_v44 = vpop.eup %234  ;;  %v186_v45 = vadd.f32 %v178_v39, %v123_v30  ;;  %v179_v46 = vsub.f32 0.0, %v165_v40  ;;  %v167_v47 = vmul.f32 0.6931472, %v233_v42  ;;  %252 = vlog2.f32 %v161_v41 }
  0x40   :  { %v129_v52 = vmul.f32 0.6931472, %v235_v44 }
  0x41   :  { %v237_v48 = vpop.eup %236  ;;  %194 = vst [vmem:[#allocation8] sm:$0xff] %v186_v45  ;;  %v187_v49 = vadd.f32 %v179_v46, %v125_v37  ;;  %v180_v50 = vsub.f32 0.0, %v167_v47 }
  0x42   :  { %v239_v51 = vpop.eup %238  ;;  %v169_v53 = vmul.f32 0.6931472, %v237_v48 }
  0x43   :  { %195 = vst [vmem:[#allocation8 + $0x8] sm:$0xff] %v187_v49  ;;  %v188_v54 = vadd.f32 %v180_v50, %v127_v43  ;;  %v131_v58 = vmul.f32 0.6931472, %v239_v51 }
  0x44   :  { %v241_v55 = vpop.eup %240  ;;  %v181_v56 = vsub.f32 0.0, %v169_v53 }
  0x45   :  { %v243_v57 = vpop.eup %242  ;;  %196 = vst [vmem:[#allocation8 + $0x10] sm:$0xff] %v188_v54  ;;  %v171_v59 = vmul.f32 0.6931472, %v241_v55 }
  0x46   :  { %v189_v60 = vadd.f32 %v181_v56, %v129_v52  ;;  %v133_v0 = vmul.f32 0.6931472, %v243_v57 }
  0x47   :  { %v245_v61 = vpop.eup %244  ;;  %v182_v62 = vsub.f32 0.0, %v171_v59 }
  0x48   :  { %v247_v63 = vpop.eup %246  ;;  %197 = vst [vmem:[#allocation8 + $0x18] sm:$0xff] %v189_v60  ;;  %v173_v1 = vmul.f32 0.6931472, %v245_v61 }
  0x49   :  { %v249_v2 = vpop.eup %248  ;;  %v190_v3 = vadd.f32 %v182_v62, %v131_v58  ;;  %v135_v6 = vmul.f32 0.6931472, %v247_v63 }
  0x4a   :  { %v251_v4 = vpop.eup %250  ;;  %v183_v5 = vsub.f32 0.0, %v173_v1  ;;  %v175_v7 = vmul.f32 0.6931472, %v249_v2 }
  0x4b   :  { %198 = vst [vmem:[#allocation8 + $0x20] sm:$0xff] %v190_v3  ;;  %v137_v11 = vmul.f32 0.6931472, %v251_v4 }
  0x4c   :  { %v253_v8 = vpop.eup %252  ;;  %v191_v9 = vadd.f32 %v183_v5, %v133_v0  ;;  %v184_v10 = vsub.f32 0.0, %v175_v7 }
  0x4d   :  { %v177_v12 = vmul.f32 0.6931472, %v253_v8 }
  0x4e   :  { %199 = vst [vmem:[#allocation8 + $0x28] sm:$0xff] %v191_v9  ;;  %v192_v13 = vadd.f32 %v184_v10, %v135_v6 }
  0x4f   :  { %v185_v14 = vsub.f32 0.0, %v177_v12 }
  0x50   :  { %200 = vst [vmem:[#allocation8 + $0x30] sm:$0xff] %v192_v13 }
  0x51   :  { %v193_v15 = vadd.f32 %v185_v14, %v137_v11 }
  0x53   :  { %201 = vst [vmem:[#allocation8 + $0x38] sm:$0xff] %v193_v15 }
  0x54   :  { %325 = shalt.err (!%p322_p5)
}
  0x55   :  { %211 = dma.vmem_to_hbm [thread:$0]  %s209_s2, 1024, %s379_s3, [#allocation4]  }
  0x56   :  { %338 = dma.done.wait [#allocation4], 1024  }
  0x57   :  { %339 = vsyncadd [#allocation4], 4294966272 }
  0x58   :  { %215 = vsyncpa [#allocation3], 1 }
  0x59   :  { %216 = vsyncpa [#allocation6], 1 }
  0x5a   :  { %217 = vsyncpa [#allocation4], 1 }

</bundles_post_ra>
